<compile_context>
chip_gen: v7x
topology: tpu7x:2x2x1
jax: 0.10.0
libtpu: 0.0.40
codegen_flags: <defaults>
</compile_context>

<pallas_src>
import functools

import jax
import jax.numpy as jnp
from jax import lax
from jax.experimental import pallas as pl
from jax.experimental.pallas import tpu as pltpu

BN_EPS = 1e-5


# ---------------------------------------------------------------------------
# Kernels
# ---------------------------------------------------------------------------

def _conv_bn_kernel(p_ref, w_ref, g_ref, b_ref, o_ref, *, mxu_dtype):
    """One grid step = one im2col'ed conv GEMM + fused training-mode BatchNorm.

    p_ref : (1, M, K)      im2col patches, M = B*Hout*Wout, K = Cin*9
    w_ref : (1, K, Cout)   flattened OIHW conv weight (possibly several
                           projections concatenated along Cout)
    g_ref : (1, 1, Cout)   BN gamma (attention scale may be pre-folded in)
    b_ref : (1, 1, Cout)   BN beta
    o_ref : (1, M, Cout)   BN(conv(x)) already in 'b (h w) c' token layout
    """
    _, M, K = p_ref.shape
    Cout = w_ref.shape[2]

    p = p_ref[...].reshape(M, K).astype(mxu_dtype)
    wmat = w_ref[...].reshape(K, Cout).astype(mxu_dtype)
    # conv as a single GEMM with batch folded into M (MXU friendly)
    acc = jnp.dot(p, wmat, preferred_element_type=jnp.float32)          # (M, Cout)

    # single-pass BatchNorm batch statistics over rows (== B,H,W), per channel
    inv_n = 1.0 / M
    mean = jnp.sum(acc, axis=0, keepdims=True) * inv_n                  # (1, Cout)
    ex2 = jnp.sum(acc * acc, axis=0, keepdims=True) * inv_n
    var = ex2 - mean * mean
    inv = lax.rsqrt(var + BN_EPS)
    gamma = g_ref[...].reshape(1, Cout)
    beta = b_ref[...].reshape(1, Cout)
    scale = gamma * inv
    shift = beta - mean * scale
    o_ref[...] = (acc * scale + shift).reshape(1, M, Cout)


def _attention_kernel(q_ref, k_ref, v_ref, wp_ref, bp_ref, o_ref, *,
                      batch, heads, mxu_dtype):
    """One grid step = one cross-attention direction (all batches & heads)
    fused with the output Linear.

    q_ref : (1, B*H, Nq, D)   (1/sqrt(C) already folded into q upstream)
    k_ref : (1, B*H, Nk, D)
    v_ref : (1, B*H, Nk, D)
    wp_ref: (1, C, C)         Linear weight transposed -> (in = H*D, out = C)
    bp_ref: (1, 1, C)
    o_ref : (1, B*Nq, C)
    """
    _, G, Nq, D = q_ref.shape
    Nk = k_ref.shape[2]
    C = wp_ref.shape[2]

    q = q_ref[...].reshape(G, Nq, D).astype(mxu_dtype)
    k = k_ref[...].reshape(G, Nk, D).astype(mxu_dtype)
    v = v_ref[...].reshape(G, Nk, D).astype(mxu_dtype)

    # scores + softmax (f32 statistics)
    s = jnp.einsum('gqd,gkd->gqk', q, k,
                   preferred_element_type=jnp.float32)                  # (G,Nq,Nk)
    m = jnp.max(s, axis=-1, keepdims=True)
    e = jnp.exp(s - m)
    inv_l = pl.reciprocal(jnp.sum(e, axis=-1, keepdims=True), approx=True)
    p = (e * inv_l).astype(mxu_dtype)
    o = jnp.einsum('gqk,gkd->gqd', p, v,
                   preferred_element_type=jnp.float32)                  # (G,Nq,D)

    # head-concat folded into ONE wide GEMM: (B*Nq, H*D) @ (H*D, C)
    o4 = o.reshape(batch, heads, Nq, D)
    o_cat = jnp.concatenate([o4[:, hh] for hh in range(heads)], axis=-1)
    o2 = o_cat.reshape(batch * Nq, heads * D).astype(mxu_dtype)
    wp = wp_ref[...].reshape(C, C).astype(mxu_dtype)
    out = jnp.dot(o2, wp, preferred_element_type=jnp.float32)
    out = out + bp_ref[...].reshape(1, C)
    o_ref[...] = out.reshape(1, batch * Nq, C)


# ---------------------------------------------------------------------------
# pallas_call wrappers
# ---------------------------------------------------------------------------

def _conv_bn_call(patches, weights, gamma, beta, *, mxu_dtype=jnp.float32):
    P, M, K = patches.shape
    Cout = weights.shape[2]
    kernel = functools.partial(_conv_bn_kernel, mxu_dtype=mxu_dtype)
    return pl.pallas_call(
        kernel,
        out_shape=jax.ShapeDtypeStruct((P, M, Cout), jnp.float32),
        grid_spec=pltpu.PrefetchScalarGridSpec(
            num_scalar_prefetch=0,
            grid=(P,),
            in_specs=[
                pl.BlockSpec((1, M, K), lambda i: (i, 0, 0)),
                pl.BlockSpec((1, K, Cout), lambda i: (i, 0, 0)),
                pl.BlockSpec((1, 1, Cout), lambda i: (i, 0, 0)),
                pl.BlockSpec((1, 1, Cout), lambda i: (i, 0, 0)),
            ],
            out_specs=pl.BlockSpec((1, M, Cout), lambda i: (i, 0, 0)),
        ),
        compiler_params=pltpu.CompilerParams(
            dimension_semantics=("parallel",)),
    )(patches, weights, gamma, beta)


def _attention_call(q, k, v, wp, bp, *, batch, heads, mxu_dtype=jnp.float32):
    E, G, Nq, D = q.shape
    Nk = k.shape[2]
    C = wp.shape[2]
    kernel = functools.partial(_attention_kernel, batch=batch, heads=heads,
                               mxu_dtype=mxu_dtype)
    return pl.pallas_call(
        kernel,
        out_shape=jax.ShapeDtypeStruct((E, batch * Nq, C), jnp.float32),
        grid_spec=pltpu.PrefetchScalarGridSpec(
            num_scalar_prefetch=0,
            grid=(E,),
            in_specs=[
                pl.BlockSpec((1, G, Nq, D), lambda e: (e, 0, 0, 0)),
                pl.BlockSpec((1, G, Nk, D), lambda e: (e, 0, 0, 0)),
                pl.BlockSpec((1, G, Nk, D), lambda e: (e, 0, 0, 0)),
                pl.BlockSpec((1, C, C), lambda e: (e, 0, 0)),
                pl.BlockSpec((1, 1, C), lambda e: (e, 0, 0)),
            ],
            out_specs=pl.BlockSpec((1, batch * Nq, C), lambda e: (e, 0, 0)),
        ),
        compiler_params=pltpu.CompilerParams(
            dimension_semantics=("parallel",)),
    )(q, k, v, wp, bp)


# ---------------------------------------------------------------------------
# Wrapper (layout glue only)
# ---------------------------------------------------------------------------

def _im2col(x4, ksize, stride, pad):
    """NCHW -> (B*Hout*Wout, Cin*k*k); tap order matches OIHW weight flatten."""
    B, Cin, H, W = x4.shape
    xp = jnp.pad(x4, ((0, 0), (0, 0), (pad, pad), (pad, pad)))
    Hout = (H + 2 * pad - ksize) // stride + 1
    Wout = (W + 2 * pad - ksize) // stride + 1
    taps = []
    for di in range(ksize):
        for dj in range(ksize):
            taps.append(xp[:, :, di:di + stride * Hout:stride,
                               dj:dj + stride * Wout:stride])
    cols = jnp.stack(taps, axis=2)                   # (B, Cin, k*k, Hout, Wout)
    cols = jnp.transpose(cols, (0, 3, 4, 1, 2))      # (B, Hout, Wout, Cin, k*k)
    return cols.reshape(B * Hout * Wout, Cin * ksize * ksize), Hout, Wout


def attention_forward(x, y, h, w, params, *, num_heads, k_v_stride=2,
                      mxu_dtype=jnp.float32):
    B, N, Cin = x.shape
    assert N == h * w
    Cout = params["q1_w"].shape[0]
    D = Cout // num_heads
    scale = float(Cout) ** -0.5

    # glue: tokens -> NCHW images
    x4 = jnp.transpose(x, (0, 2, 1)).reshape(B, Cin, h, w).astype(jnp.float32)
    y4 = jnp.transpose(y, (0, 2, 1)).reshape(B, Cin, h, w).astype(jnp.float32)

    # glue: im2col so every conv becomes one lane-dense GEMM
    pq_x, Hq, Wq = _im2col(x4, 3, 1, 1)
    pq_y, _, _ = _im2col(y4, 3, 1, 1)
    pk_x, Hk, Wk = _im2col(x4, 3, k_v_stride, 1)
    pk_y, _, _ = _im2col(y4, 3, k_v_stride, 1)
    Nq, Nk = Hq * Wq, Hk * Wk

    def wflat(name):
        return params[name].astype(jnp.float32).reshape(Cout, -1).T   # (Cin*9, Cout)

    # query projections [query1(x), query2(y)]; 1/sqrt(C) folded into BN affine
    q_tok = _conv_bn_call(
        jnp.stack([pq_x, pq_y]),
        jnp.stack([wflat("q1_w"), wflat("q2_w")]),
        (jnp.stack([params["q1_g"], params["q2_g"]]) * scale
         ).reshape(2, 1, Cout).astype(jnp.float32),
        (jnp.stack([params["q1_b"], params["q2_b"]]) * scale
         ).reshape(2, 1, Cout).astype(jnp.float32),
        mxu_dtype=mxu_dtype,
    )                                                                  # (2, B*Nq, Cout)

    # key+value projections: per source image, key & value weights concatenated
    # along Cout so the strided patches are read and multiplied once.
    kv_tok = _conv_bn_call(
        jnp.stack([pk_x, pk_y]),
        jnp.stack([
            jnp.concatenate([wflat("k1_w"), wflat("v1_w")], axis=1),
            jnp.concatenate([wflat("k2_w"), wflat("v2_w")], axis=1)]),
        jnp.stack([
            jnp.concatenate([params["k1_g"], params["v1_g"]]),
            jnp.concatenate([params["k2_g"], params["v2_g"]])]
        ).reshape(2, 1, 2 * Cout).astype(jnp.float32),
        jnp.stack([
            jnp.concatenate([params["k1_b"], params["v1_b"]]),
            jnp.concatenate([params["k2_b"], params["v2_b"]])]
        ).reshape(2, 1, 2 * Cout).astype(jnp.float32),
        mxu_dtype=mxu_dtype,
    )                                                                  # (2, B*Nk, 2*Cout)

    # glue: split heads  (B*Nt, C) -> (B*H, Nt, D)   (g = b*H + h)
    def heads(tok, Nt):
        t = jnp.transpose(tok.reshape(B, Nt, num_heads, D), (0, 2, 1, 3))
        return t.reshape(B * num_heads, Nt, D)

    q_dec = heads(q_tok[0], Nq)               # query1(x)
    q_enc = heads(q_tok[1], Nq)               # query2(y)
    k_dec = heads(kv_tok[0][:, :Cout], Nk)    # key1(x)
    v_dec = heads(kv_tok[0][:, Cout:], Nk)    # value1(x)
    k_enc = heads(kv_tok[1][:, :Cout], Nk)    # key2(y)
    v_enc = heads(kv_tok[1][:, Cout:], Nk)    # value2(y)

    # direction 0 = encoder path: q_decoder attends k/v_encoder, then proj_en
    # direction 1 = decoder path: q_encoder attends k/v_decoder, then proj_de
    q_all = jnp.stack([q_dec, q_enc])
    k_all = jnp.stack([k_enc, k_dec])
    v_all = jnp.stack([v_enc, v_dec])
    wp_all = jnp.stack([params["proj_en_w"].astype(jnp.float32).T,
                        params["proj_de_w"].astype(jnp.float32).T])    # (2, C, C)
    bp_all = jnp.stack([params["proj_en_b"], params["proj_de_b"]]
                       ).reshape(2, 1, Cout).astype(jnp.float32)

    out = _attention_call(q_all, k_all, v_all, wp_all, bp_all,
                          batch=B, heads=num_heads, mxu_dtype=mxu_dtype)
    out = out.reshape(2, B, Nq, Cout)
    return out[0], out[1]            # (encoder, decoder), each (B, N, Cout)


# ---------------------------------------------------------------------------
# Pure-JAX reference of the PyTorch module (training-mode BN, dropout p=0)
# ---------------------------------------------------------------------------

def _conv_bn_tokens_ref(x4, wmat, gamma, beta, stride):
    out = lax.conv_general_dilated(
        x4, wmat, (stride, stride), ((1, 1), (1, 1)),
        dimension_numbers=("NCHW", "OIHW", "NCHW"),
        precision=lax.Precision.HIGHEST)
    mean = jnp.mean(out, axis=(0, 2, 3), keepdims=True)
    var = jnp.mean((out - mean) ** 2, axis=(0, 2, 3), keepdims=True)
    out = (out - mean) * lax.rsqrt(var + BN_EPS)
    out = out * gamma.reshape(1, -1, 1, 1) + beta.reshape(1, -1, 1, 1)
    B, C, Ho, Wo = out.shape
    return jnp.transpose(out, (0, 2, 3, 1)).reshape(B, Ho * Wo, C)


def attention_reference(x, y, h, w, params, *, num_heads, k_v_stride=2):
    B, N, Cin = x.shape
    C = params["q1_w"].shape[0]
    D = C // num_heads
    scale = float(C) ** -0.5
    x4 = jnp.transpose(x, (0, 2, 1)).reshape(B, Cin, h, w)
    y4 = jnp.transpose(y, (0, 2, 1)).reshape(B, Cin, h, w)

    qd = _conv_bn_tokens_ref(x4, params["q1_w"], params["q1_g"], params["q1_b"], 1)
    qe = _conv_bn_tokens_ref(y4, params["q2_w"], params["q2_g"], params["q2_b"], 1)
    kd = _conv_bn_tokens_ref(x4, params["k1_w"], params["k1_g"], params["k1_b"], k_v_stride)
    ke = _conv_bn_tokens_ref(y4, params["k2_w"], params["k2_g"], params["k2_b"], k_v_stride)
    vd = _conv_bn_tokens_ref(x4, params["v1_w"], params["v1_g"], params["v1_b"], k_v_stride)
    ve = _conv_bn_tokens_ref(y4, params["v2_w"], params["v2_g"], params["v2_b"], k_v_stride)

    def heads(t):
        Bt, Nt, _ = t.shape
        return jnp.transpose(t.reshape(Bt, Nt, num_heads, D), (0, 2, 1, 3))

    qd, qe, kd, ke, vd, ve = map(heads, (qd, qe, kd, ke, vd, ve))

    def attend(q, k, v, wp, bp):
        s = jnp.einsum("bhqd,bhkd->bhqk", q, k,
                       precision=lax.Precision.HIGHEST) * scale
        p = jax.nn.softmax(s, axis=-1)
        o = jnp.einsum("bhqk,bhkd->bhqd", p, v, precision=lax.Precision.HIGHEST)
        o = jnp.transpose(o, (0, 2, 1, 3)).reshape(B, -1, C)
        return jnp.einsum("bnc,dc->bnd", o, wp,
                          precision=lax.Precision.HIGHEST) + bp

    encoder = attend(qd, ke, ve, params["proj_en_w"], params["proj_en_b"])
    decoder = attend(qe, kd, vd, params["proj_de_w"], params["proj_de_b"])
    return encoder, decoder


if __name__ == "__main__":
    key = jax.random.PRNGKey(0)
    B, h, w = 2, 8, 8
    dim_in, dim_out = 16, 32
    num_heads = 4
    k_v_stride = 2                    # forward reshapes k/v to N//4 tokens
    N = h * w

    keys = jax.random.split(key, 24)
    x = jax.random.normal(keys[0], (B, N, dim_in), jnp.float32)
    y = jax.random.normal(keys[1], (B, N, dim_in), jnp.float32)

    fan_in = dim_in * 9
    cbound = 1.0 / (fan_in ** 0.5)
    lbound = 1.0 / (dim_out ** 0.5)

    params = {}
    names = ["q1", "q2", "k1", "k2", "v1", "v2"]
    for i, nm in enumerate(names):
        params[f"{nm}_w"] = jax.random.uniform(
            keys[2 + i], (dim_out, dim_in, 3, 3), jnp.float32, -cbound, cbound)
        params[f"{nm}_g"] = 1.0 + 0.1 * jax.random.normal(keys[8 + i], (dim_out,), jnp.float32)
        params[f"{nm}_b"] = 0.1 * jax.random.normal(keys[14 + i], (dim_out,), jnp.float32)
    params["proj_en_w"] = jax.random.uniform(keys[20], (dim_out, dim_out), jnp.float32, -lbound, lbound)
    params["proj_en_b"] = jax.random.uniform(keys[21], (dim_out,), jnp.float32, -lbound, lbound)
    params["proj_de_w"] = jax.random.uniform(keys[22], (dim_out, dim_out), jnp.float32, -lbound, lbound)
    params["proj_de_b"] = jax.random.uniform(keys[23], (dim_out,), jnp.float32, -lbound, lbound)

    enc, dec = attention_forward(x, y, h, w, params,
                                 num_heads=num_heads, k_v_stride=k_v_stride)
    enc = jax.block_until_ready(enc)
    dec = jax.block_until_ready(dec)

    enc_ref, dec_ref = attention_reference(x, y, h, w, params,
                                           num_heads=num_heads, k_v_stride=k_v_stride)

    assert enc.shape == (B, N, dim_out), enc.shape
    assert dec.shape == (B, N, dim_out), dec.shape
    err_e = float(jnp.max(jnp.abs(enc - enc_ref)))
    err_d = float(jnp.max(jnp.abs(dec - dec_ref)))
    assert err_e < 2e-3 and err_d < 2e-3, f"max abs diff enc={err_e} dec={err_d}"
    print("KERNEL_OK")
</pallas_src>

<mosaic_0001>
module attributes {stable_mosaic.version = 11 : i64} {
  func.func @_conv_bn_kernel(%arg0: i32, %arg1: memref<1x128x144xf32, #tpu.memory_space<vmem>>, %arg2: memref<1x144x32xf32, #tpu.memory_space<vmem>>, %arg3: memref<1x1x32xf32, #tpu.memory_space<vmem>>, %arg4: memref<1x1x32xf32, #tpu.memory_space<vmem>>, %arg5: memref<1x128x32xf32, #tpu.memory_space<vmem>>) attributes {dimension_semantics = [#tpu.dimension_semantics<parallel>], iteration_bounds = array<i64: 2>, scalar_prefetch = 0 : i64, scratch_operands = 0 : i64, tpu.core_type = #tpu.core_type<tc>, window_params = [{transform_indices = @transform_0, window_bounds = array<i64: 1, 128, 144>}, {transform_indices = @transform_1, window_bounds = array<i64: 1, 144, 32>}, {transform_indices = @transform_2, window_bounds = array<i64: 1, 1, 32>}, {transform_indices = @transform_3, window_bounds = array<i64: 1, 1, 32>}, {transform_indices = @transform_4, window_bounds = array<i64: 1, 128, 32>}]} {
    %c0 = arith.constant 0 : index
    %c0_0 = arith.constant 0 : index
    %c0_1 = arith.constant 0 : index
    %0 = vector.load %arg1[%c0, %c0_0, %c0_1] : memref<1x128x144xf32, #tpu.memory_space<vmem>>, vector<1x128x144xf32>
    %1 = vector.shape_cast %0 : vector<1x128x144xf32> to vector<128x144xf32>
    %c0_2 = arith.constant 0 : index
    %c0_3 = arith.constant 0 : index
    %c0_4 = arith.constant 0 : index
    %2 = vector.load %arg2[%c0_2, %c0_3, %c0_4] : memref<1x144x32xf32, #tpu.memory_space<vmem>>, vector<1x144x32xf32>
    %3 = vector.shape_cast %2 : vector<1x144x32xf32> to vector<144x32xf32>
    %cst = arith.constant dense<0.000000e+00> : vector<128x32xf32>
    %4 = tpu.matmul %1, %3, %cst {dimension_numbers = #tpu.dot_dimension_numbers<[1], [0], [0], [1], [0, 0, 1, 1], [], []>} : vector<128x144xf32>, vector<144x32xf32>, vector<128x32xf32> -> vector<128x32xf32>
    %cst_5 = arith.constant dense<0.000000e+00> : vector<32xf32>
    %5 = vector.multi_reduction <add>, %4, %cst_5 [0] : vector<128x32xf32> to vector<32xf32>
    %6 = vector.shape_cast %5 : vector<32xf32> to vector<1x32xf32>
    %cst_6 = arith.constant 7.812500e-03 : f32
    %7 = vector.broadcast %cst_6 : f32 to vector<1x32xf32>
    %8 = arith.mulf %6, %7 : vector<1x32xf32>
    %9 = arith.mulf %4, %4 : vector<128x32xf32>
    %cst_7 = arith.constant dense<0.000000e+00> : vector<32xf32>
    %10 = vector.multi_reduction <add>, %9, %cst_7 [0] : vector<128x32xf32> to vector<32xf32>
    %11 = vector.shape_cast %10 : vector<32xf32> to vector<1x32xf32>
    %cst_8 = arith.constant 7.812500e-03 : f32
    %12 = vector.broadcast %cst_8 : f32 to vector<1x32xf32>
    %13 = arith.mulf %11, %12 : vector<1x32xf32>
    %14 = arith.mulf %8, %8 : vector<1x32xf32>
    %15 = arith.subf %13, %14 : vector<1x32xf32>
    %cst_9 = arith.constant 9.99999974E-6 : f32
    %16 = vector.broadcast %cst_9 : f32 to vector<1x32xf32>
    %17 = arith.addf %15, %16 : vector<1x32xf32>
    %18 = math.rsqrt %17 : vector<1x32xf32>
    %c0_10 = arith.constant 0 : index
    %c0_11 = arith.constant 0 : index
    %c0_12 = arith.constant 0 : index
    %19 = vector.load %arg3[%c0_10, %c0_11, %c0_12] : memref<1x1x32xf32, #tpu.memory_space<vmem>>, vector<1x1x32xf32>
    %20 = vector.shape_cast %19 : vector<1x1x32xf32> to vector<1x32xf32>
    %c0_13 = arith.constant 0 : index
    %c0_14 = arith.constant 0 : index
    %c0_15 = arith.constant 0 : index
    %21 = vector.load %arg4[%c0_13, %c0_14, %c0_15] : memref<1x1x32xf32, #tpu.memory_space<vmem>>, vector<1x1x32xf32>
    %22 = vector.shape_cast %21 : vector<1x1x32xf32> to vector<1x32xf32>
    %23 = arith.mulf %20, %18 : vector<1x32xf32>
    %24 = arith.mulf %8, %23 : vector<1x32xf32>
    %25 = arith.subf %22, %24 : vector<1x32xf32>
    %26 = vector.broadcast %23 : vector<1x32xf32> to vector<128x32xf32>
    %27 = arith.mulf %4, %26 : vector<128x32xf32>
    %28 = vector.broadcast %25 : vector<1x32xf32> to vector<128x32xf32>
    %29 = arith.addf %27, %28 : vector<128x32xf32>
    %30 = vector.shape_cast %29 : vector<128x32xf32> to vector<1x128x32xf32>
    %c0_16 = arith.constant 0 : index
    %c0_17 = arith.constant 0 : index
    %c0_18 = arith.constant 0 : index
    %31 = vector.load %arg5[%c0_16, %c0_17, %c0_18] : memref<1x128x32xf32, #tpu.memory_space<vmem>>, vector<1x128x32xf32>
    tpu.vector_store %arg5[%c0_16, %c0_17, %c0_18], %30 {strides = array<i32>} : memref<1x128x32xf32, #tpu.memory_space<vmem>>, vector<1x128x32xf32>,
    return
  }
  func.func @transform_0(%arg0: i32) -> (i32, i32, i32) {
    %c0_i32 = arith.constant 0 : i32
    %c0_i32_0 = arith.constant 0 : i32
    %c0_i32_1 = arith.constant 0 : i32
    return %arg0, %c0_i32, %c0_i32_0 : i32, i32, i32
  }
  func.func @transform_1(%arg0: i32) -> (i32, i32, i32) {
    %c0_i32 = arith.constant 0 : i32
    %c0_i32_0 = arith.constant 0 : i32
    %c0_i32_1 = arith.constant 0 : i32
    return %arg0, %c0_i32, %c0_i32_0 : i32, i32, i32
  }
  func.func @transform_2(%arg0: i32) -> (i32, i32, i32) {
    %c0_i32 = arith.constant 0 : i32
    %c0_i32_0 = arith.constant 0 : i32
    %c0_i32_1 = arith.constant 0 : i32
    return %arg0, %c0_i32, %c0_i32_0 : i32, i32, i32
  }
  func.func @transform_3(%arg0: i32) -> (i32, i32, i32) {
    %c0_i32 = arith.constant 0 : i32
    %c0_i32_0 = arith.constant 0 : i32
    %c0_i32_1 = arith.constant 0 : i32
    return %arg0, %c0_i32, %c0_i32_0 : i32, i32, i32
  }
  func.func @transform_4(%arg0: i32) -> (i32, i32, i32) {
    %c0_i32 = arith.constant 0 : i32
    %c0_i32_0 = arith.constant 0 : i32
    %c0_i32_1 = arith.constant 0 : i32
    return %arg0, %c0_i32, %c0_i32_0 : i32, i32, i32
  }
}

</mosaic_0001>

<bundles_post_ra>
// kernel: tpu_custom_call.1
= control target key start
LH: loop header
LB: loop body
LE: loop exit
PB: predicated region body
PF: predicated region fallthrough
CT: control target
= control target key end

     0   :  { %s858_s15 = smov 0   ;;  %s1141_s0 = inlined_call_operand.vmem [shape: f32[2,128,144], index: 0, kind: input, shape index: {}]   ;;  %s1142_s1 = inlined_call_operand.vmem [shape: f32[2,144,32], index: 1, kind: input, shape index: {}]   ;;  %s1143_s2 = inlined_call_operand.vmem [shape: f32[2,1,32], index: 2, kind: input, shape index: {}]   ;;  %s1144_s3 = inlined_call_operand.vmem [shape: f32[2,1,32], index: 3, kind: input, shape index: {}]   ;;  %s1145_s4 = inlined_call_operand.vmem [shape: f32[2,128,32], index: 4, kind: output, shape index: {}]  }
   0x1 LB: > { %s737_s16 = sadd.s32 4294967295, %s830_s15   ;;  %p741_p0 = scmp.ge.s32.totalorder %s830_s15, 1  ;;  %s830_s15 = sphi %s858_s15, %s14_s15  }
   0x2   : > { %p188_p1 = scmp.lt.s32.totalorder %s830_s15, 3 }
   0x4   : > { %p189_p2 = pnand %p741_p0, %p188_p1 }
   0x5   : > { %p225_p3 = scmp.lt.s32.totalorder (!%p189_p2), %s737_s16, 1  ;;  %v832_v0 = vmov (!%p189_p2), 0.0|0.0   ;;  %vm296_vm0 = vcmask (!%p189_p2), 130048   ;;  %vm490_vm1 = vcmask (!%p189_p2), 261120  }
   0x6   : > { %192 = sbr.rel (%p189_p2) target bundleno = 366 (0x16e), region = 36  ;;  %767 = vmatprep.subr.bf16.mxu0 (!%p189_p2), %v832_v0  ;;  %794 = vmatprep.subr.bf16.mxu1 (!%p189_p2), %v832_v0 }
   0xd   : > { %s1147_s16 = smov (!%p225_p3, %s737_s16), 1 }
   0xe   : > { %s765_s17 = sshll.u32 %s1147_s16, 8  ;;  %s812_s18 = smul.u32 144, %s1147_s16 }
   0xf   : > { %s875_s21 = scalar_lea.vmem %s1141_s0, %s765_s17  ;;  %s237_s27 = scalar_lea.vmem %s1143_s2, %s1147_s16 }
  0x10   : > { %s880_s24 = scalar_lea.vmem %s1142_s1, %s812_s18  ;;  %v247_v1 = vld [vmem:[%s875_s21 + $0x8] sm:$0xff]  ;;  %v246_v30 = vld [vmem:[%s875_s21] sm:$0xff]  ;;  %v249_v32 = vld [vmem:[%s875_s21 + $0x18] sm:$0xff]  ;;  %s240_s30 = scalar_lea.vmem %s1144_s3, %s1147_s16 }
  0x11   : > { %v278_v2 = vld [vmem:[%s880_s24] sm:$0xff]  ;;  %v279_v3 = vld [vmem:[%s880_s24 + $0x8] sm:$0xff]  ;;  %v280_v4 = vld [vmem:[%s880_s24 + $0x10] sm:$0xff]  ;;  %747 = vmatprep.mubr.msk.f32.mxu0 %vm296_vm0, %v247_v1  ;;  %s766_s5 = sshll.u32 %s1147_s16, 7 }
  0x12   : > { %v768_v5 = vpack.c.bf16 %v279_v3, %v278_v2  ;;  %v281_v6 = vld [vmem:[%s880_s24 + $0x18] sm:$0xff]  ;;  %v282_v8 = vld [vmem:[%s880_s24 + $0x20] sm:$0xff]  ;;  %v283_v9 = vld [vmem:[%s880_s24 + $0x28] sm:$0xff]  ;;  %s1104_s8 = scalar_lea.vmem %s1145_s4, %s766_s5 }
  0x13   : > { %v771_v7 = vpack.c.bf16 %v281_v6, %v280_v4  ;;  %v774_v10 = vpack.c.bf16 %v283_v9, %v282_v8  ;;  %v263_v11 = vld [vmem:[%s875_s21 + $0x88] sm:$0xff]  ;;  %v284_v12 = vld [vmem:[%s880_s24 + $0x30] sm:$0xff]  ;;  %v285_v13 = vld [vmem:[%s880_s24 + $0x38] sm:$0xff] }
  0x14   : > { %769 = vmatpush1.bf16.msra.mxu0 %v768_v5  ;;  %803 = vmatpush1.bf16.msra.mxu1 %v768_v5  ;;  %v777_v14 = vpack.c.bf16 %v285_v13, %v284_v12  ;;  %v286_v15 = vld [vmem:[%s880_s24 + $0x40] sm:$0xff]  ;;  %v287_v16 = vld [vmem:[%s880_s24 + $0x48] sm:$0xff]  ;;  %v288_v18 = vld [vmem:[%s880_s24 + $0x50] sm:$0xff] }
  0x15   : > { %770 = vmatprep.subr.bf16.mxu0 %v832_v0  ;;  %795 = vmatprep.subr.bf16.mxu1 %v832_v0  ;;  %v780_v17 = vpack.c.bf16 %v287_v16, %v286_v15  ;;  %v289_v19 = vld [vmem:[%s880_s24 + $0x58] sm:$0xff]  ;;  %v290_v21 = vld [vmem:[%s880_s24 + $0x60] sm:$0xff]  ;;  %v291_v22 = vld [vmem:[%s880_s24 + $0x68] sm:$0xff] }
  0x16   : > { %755 = vmatprep.mubr.msk.f32.mxu1 %vm296_vm0, %v263_v11  ;;  %v783_v20 = vpack.c.bf16 %v289_v19, %v288_v18  ;;  %v786_v23 = vpack.c.bf16 %v291_v22, %v290_v21  ;;  %v292_v24 = vld [vmem:[%s880_s24 + $0x70] sm:$0xff]  ;;  %v293_v25 = vld [vmem:[%s880_s24 + $0x78] sm:$0xff]  ;;  %v294_v27 = vld [vmem:[%s880_s24 + $0x80] sm:$0xff] }
  0x17   : > { %v789_v26 = vpack.c.bf16 %v293_v25, %v292_v24  ;;  %v295_v28 = vld [vmem:[%s880_s24 + $0x88] sm:$0xff]  ;;  %v262_v31 = vld [vmem:[%s875_s21 + $0x80] sm:$0xff]  ;;  %v265_v33 = vld [vmem:[%s875_s21 + $0x98] sm:$0xff] }
  0x18   : > { %772 = vmatpush1.bf16.msra.mxu0 %v771_v7  ;;  %804 = vmatpush1.bf16.msra.mxu1 %v771_v7  ;;  %v792_v29 = vpack.c.bf16 %v295_v28, %v294_v27  ;;  %v248_v34 = vld [vmem:[%s875_s21 + $0x10] sm:$0xff]  ;;  %v251_v36 = vld [vmem:[%s875_s21 + $0x28] sm:$0xff]  ;;  %v250_v38 = vld [vmem:[%s875_s21 + $0x20] sm:$0xff] }
  0x19   : > { %773 = vmatprep.subr.bf16.mxu0 %v832_v0  ;;  %796 = vmatprep.subr.bf16.mxu1 %v832_v0  ;;  %v264_v35 = vld [vmem:[%s875_s21 + $0x90] sm:$0xff]  ;;  %v267_v37 = vld [vmem:[%s875_s21 + $0xa8] sm:$0xff]  ;;  %v266_v39 = vld [vmem:[%s875_s21 + $0xa0] sm:$0xff] }
  0x1a   : > { %v253_v40 = vld [vmem:[%s875_s21 + $0x38] sm:$0xff]  ;;  %v252_v42 = vld [vmem:[%s875_s21 + $0x30] sm:$0xff]  ;;  %v255_v44 = vld [vmem:[%s875_s21 + $0x48] sm:$0xff] }
  0x1b   : > { %v269_v41 = vld [vmem:[%s875_s21 + $0xb8] sm:$0xff]  ;;  %v268_v43 = vld [vmem:[%s875_s21 + $0xb0] sm:$0xff]  ;;  %v271_v45 = vld [vmem:[%s875_s21 + $0xc8] sm:$0xff] }
  0x1c   : > { %775 = vmatpush1.bf16.msra.mxu0 %v774_v10  ;;  %805 = vmatpush1.bf16.msra.mxu1 %v774_v10  ;;  %v254_v46 = vld [vmem:[%s875_s21 + $0x40] sm:$0xff]  ;;  %v257_v48 = vld [vmem:[%s875_s21 + $0x58] sm:$0xff]  ;;  %v256_v50 = vld [vmem:[%s875_s21 + $0x50] sm:$0xff] }
  0x1d   : > { %776 = vmatprep.subr.bf16.mxu0 %v832_v0  ;;  %797 = vmatprep.subr.bf16.mxu1 %v832_v0  ;;  %v270_v47 = vld [vmem:[%s875_s21 + $0xc0] sm:$0xff]  ;;  %v273_v49 = vld [vmem:[%s875_s21 + $0xd8] sm:$0xff]  ;;  %v272_v51 = vld [vmem:[%s875_s21 + $0xd0] sm:$0xff] }
  0x1e   : > { %v259_v52 = vld [vmem:[%s875_s21 + $0x68] sm:$0xff]  ;;  %v258_v54 = vld [vmem:[%s875_s21 + $0x60] sm:$0xff]  ;;  %v261_v56 = vld [vmem:[%s875_s21 + $0x78] sm:$0xff] }
  0x1f   : > { %v275_v53 = vld [vmem:[%s875_s21 + $0xe8] sm:$0xff]  ;;  %v274_v55 = vld [vmem:[%s875_s21 + $0xe0] sm:$0xff]  ;;  %v277_v57 = vld [vmem:[%s875_s21 + $0xf8] sm:$0xff] }
  0x20   : > { %778 = vmatpush1.bf16.msra.mxu0 %v777_v14  ;;  %806 = vmatpush1.bf16.msra.mxu1 %v777_v14  ;;  %v260_v58 = vld [vmem:[%s875_s21 + $0x70] sm:$0xff] }
  0x21   : > { %779 = vmatprep.subr.bf16.mxu0 %v832_v0  ;;  %798 = vmatprep.subr.bf16.mxu1 %v832_v0  ;;  %v276_v59 = vld [vmem:[%s875_s21 + $0xf0] sm:$0xff] }
  0x24   : > { %781 = vmatpush1.bf16.msra.mxu0 %v780_v17  ;;  %807 = vmatpush1.bf16.msra.mxu1 %v780_v17 }
  0x25   : > { %782 = vmatprep.subr.bf16.mxu0 %v832_v0  ;;  %799 = vmatprep.subr.bf16.mxu1 %v832_v0 }
  0x28   : > { %784 = vmatpush1.bf16.msra.mxu0 %v783_v20  ;;  %808 = vmatpush1.bf16.msra.mxu1 %v783_v20 }
  0x29   : > { %785 = vmatprep.subr.bf16.mxu0 %v832_v0  ;;  %800 = vmatprep.subr.bf16.mxu1 %v832_v0 }
  0x2c   : > { %787 = vmatpush1.bf16.msra.mxu0 %v786_v23  ;;  %809 = vmatpush1.bf16.msra.mxu1 %v786_v23 }
  0x2d   : > { %788 = vmatprep.subr.bf16.mxu0 %v832_v0  ;;  %801 = vmatprep.subr.bf16.mxu1 %v832_v0 }
  0x30   : > { %790 = vmatpush1.bf16.msra.mxu0 %v789_v26  ;;  %810 = vmatpush1.bf16.msra.mxu1 %v789_v26 }
  0x31   : > { %791 = vmatprep.subr.bf16.mxu0 %v832_v0  ;;  %802 = vmatprep.subr.bf16.mxu1 %v832_v0 }
  0x34   : > { %793 = vmatpush1.bf16.msra.mxu0 %v792_v29  ;;  %811 = vmatpush1.bf16.msra.mxu1 %v792_v29 }
  0x37   : > { %410 = vmatmul.mubr.f32.vlgmr.msra.gmra.mrb[0].mxu0 %v246_v30  ;;  %450 = vmatmul.mubr.f32.vlgmr.msra.gmra.mrb[0].mxu1 %v262_v31 }
  0x38   : > { %748 = vmatprep.mubr.msk.f32.mxu0 %vm296_vm0, %v249_v32  ;;  %756 = vmatprep.mubr.msk.f32.mxu1 %vm296_vm0, %v265_v33 }
  0x3b   : > { %415 = vmatmul.mubr.f32.gmra.mrb[2].mxu0 %v248_v34  ;;  %455 = vmatmul.mubr.f32.gmra.mrb[2].mxu1 %v264_v35 }
  0x3c   : > { %749 = vmatprep.mubr.msk.f32.mxu0 %vm296_vm0, %v251_v36  ;;  %757 = vmatprep.mubr.msk.f32.mxu1 %vm296_vm0, %v267_v37 }
  0x3f   : > { %420 = vmatmul.mubr.f32.gmra.mrb[4].mxu0 %v250_v38  ;;  %460 = vmatmul.mubr.f32.gmra.mrb[4].mxu1 %v266_v39 }
  0x40   : > { %750 = vmatprep.mubr.msk.f32.mxu0 %vm296_vm0, %v253_v40  ;;  %758 = vmatprep.mubr.msk.f32.mxu1 %vm296_vm0, %v269_v41 }
  0x43   : > { %425 = vmatmul.mubr.f32.gmra.mrb[6].mxu0 %v252_v42  ;;  %465 = vmatmul.mubr.f32.gmra.mrb[6].mxu1 %v268_v43 }
  0x44   : > { %751 = vmatprep.mubr.msk.f32.mxu0 %vm296_vm0, %v255_v44  ;;  %759 = vmatprep.mubr.msk.f32.mxu1 %vm296_vm0, %v271_v45 }
  0x47   : > { %430 = vmatmul.mubr.f32.gmra.mrb[8].mxu0 %v254_v46  ;;  %470 = vmatmul.mubr.f32.gmra.mrb[8].mxu1 %v270_v47 }
  0x48   : > { %752 = vmatprep.mubr.msk.f32.mxu0 %vm296_vm0, %v257_v48  ;;  %760 = vmatprep.mubr.msk.f32.mxu1 %vm296_vm0, %v273_v49 }
  0x4b   : > { %435 = vmatmul.mubr.f32.gmra.mrb[10].mxu0 %v256_v50  ;;  %475 = vmatmul.mubr.f32.gmra.mrb[10].mxu1 %v272_v51 }
  0x4c   : > { %753 = vmatprep.mubr.msk.f32.mxu0 %vm296_vm0, %v259_v52  ;;  %761 = vmatprep.mubr.msk.f32.mxu1 %vm296_vm0, %v275_v53 }
  0x4f   : > { %440 = vmatmul.mubr.f32.gmra.mrb[12].mxu0 %v258_v54  ;;  %480 = vmatmul.mubr.f32.gmra.mrb[12].mxu1 %v274_v55 }
  0x50   : > { %754 = vmatprep.mubr.msk.f32.mxu0 %vm296_vm0, %v261_v56  ;;  %762 = vmatprep.mubr.msk.f32.mxu1 %vm296_vm0, %v277_v57 }
  0x53   : > { %445 = vmatmul.mubr.f32.gmra.mrb[14].mxu0 %v260_v58  ;;  %485 = vmatmul.mubr.f32.gmra.mrb[14].mxu1 %v276_v59 }
 0x10a   : > { %v964_v60 = vpop.f32.mrb[0].mxu0  ;;  %v966_v61 = vpop.f32.mrb[0].mxu1 }
 0x10b   : > { %v413_v62 = vpop.f32.mrb[1].mxu0  ;;  %v453_v63 = vpop.f32.mrb[1].mxu1  ;;  %v529_v0 = vmul.f32 %v964_v60, %v964_v60  ;;  %v491_v3 = vsel %vm490_vm1, %v964_v60, 0.0  ;;  %v537_v59 = vmul.f32 %v966_v61, %v966_v61 }
 0x10d   : > { %v545_v9 = vsel %vm490_vm1, %v529_v0, 0.0 }
 0x10e   : > { %v970_v1 = vpop.f32.mrb[2].mxu0  ;;  %v972_v2 = vpop.f32.mrb[2].mxu1 }
 0x10f   : > { %v492_v4 = vsel %vm490_vm1, %v970_v1, 0.0  ;;  %v530_v5 = vmul.f32 %v970_v1, %v970_v1  ;;  %v418_v6 = vpop.f32.mrb[3].mxu0  ;;  %v458_v7 = vpop.f32.mrb[3].mxu1 }
 0x110   : > { %v493_v8 = vadd.f32 %v492_v4, %v491_v3  ;;  %v538_v6 = vmul.f32 %v972_v2, %v972_v2 }
 0x111   : > { %v546_v10 = vsel %vm490_vm1, %v530_v5, 0.0  ;;  %v506_v5 = vsel %vm490_vm1, %v966_v61, 0.0 }
 0x112   : > { %v547_v11 = vadd.f32 %v546_v10, %v545_v9  ;;  %v982_v12 = vpop.f32.mrb[4].mxu0  ;;  %v984_v13 = vpop.f32.mrb[4].mxu1  ;;  %v560_v10 = vsel %vm490_vm1, %v537_v59, 0.0 }
 0x113   : > { %v494_v14 = vsel %vm490_vm1, %v982_v12, 0.0  ;;  %v531_v15 = vmul.f32 %v982_v12, %v982_v12  ;;  %v423_v16 = vpop.f32.mrb[5].mxu0  ;;  %v463_v17 = vpop.f32.mrb[5].mxu1 }
 0x114   : > { %v495_v18 = vadd.f32 %v494_v14, %v493_v8  ;;  %v539_v14 = vmul.f32 %v984_v13, %v984_v13  ;;  %v562_v17 = vsel %vm490_vm1, %v538_v6, 0.0 }
 0x115   : > { %v548_v19 = vsel %vm490_vm1, %v531_v15, 0.0 }
 0x116   : > { %v549_v20 = vadd.f32 %v548_v19, %v547_v11  ;;  %v991_v21 = vpop.f32.mrb[6].mxu0  ;;  %v993_v22 = vpop.f32.mrb[6].mxu1  ;;  %v508_v11 = vsel %vm490_vm1, %v972_v2, 0.0 }
 0x117   : > { %v496_v23 = vsel %vm490_vm1, %v991_v21, 0.0  ;;  %v532_v24 = vmul.f32 %v991_v21, %v991_v21  ;;  %v428_v25 = vpop.f32.mrb[7].mxu0  ;;  %v468_v26 = vpop.f32.mrb[7].mxu1  ;;  %v540_v19 = vmul.f32 %v993_v22, %v993_v22 }
 0x118   : > { %v497_v27 = vadd.f32 %v496_v23, %v495_v18  ;;  %v510_v18 = vsel %vm490_vm1, %v984_v13, 0.0  ;;  %v512_v25 = vsel %vm490_vm1, %v993_v22, 0.0 }
 0x119   : > { %v550_v28 = vsel %vm490_vm1, %v532_v24, 0.0  ;;  %v564_v24 = vsel %vm490_vm1, %v539_v14, 0.0 }
 0x11a   : > { %v551_v29 = vadd.f32 %v550_v28, %v549_v20  ;;  %v1000_v30 = vpop.f32.mrb[8].mxu0  ;;  %v1002_v31 = vpop.f32.mrb[8].mxu1 }
 0x11b   : > { %v498_v32 = vsel %vm490_vm1, %v1000_v30, 0.0  ;;  %v533_v33 = vmul.f32 %v1000_v30, %v1000_v30  ;;  %v433_v34 = vpop.f32.mrb[9].mxu0  ;;  %v473_v35 = vpop.f32.mrb[9].mxu1  ;;  %v541_v26 = vmul.f32 %v1002_v31, %v1002_v31 }
 0x11c   : > { %v499_v36 = vadd.f32 %v498_v32, %v497_v27  ;;  %v514_v32 = vsel %vm490_vm1, %v1002_v31, 0.0 }
 0x11d   : > { %v552_v37 = vsel %vm490_vm1, %v533_v33, 0.0 }
 0x11e   : > { %v553_v38 = vadd.f32 %v552_v37, %v551_v29  ;;  %v1009_v39 = vpop.f32.mrb[10].mxu0  ;;  %v1011_v40 = vpop.f32.mrb[10].mxu1  ;;  %v566_v29 = vsel %vm490_vm1, %v540_v19, 0.0  ;;  %v587_v19 = vld [vmem:[%s237_s27] sm:$0x1] }
 0x11f   : > { %v500_v41 = vsel %vm490_vm1, %v1009_v39, 0.0  ;;  %v534_v42 = vmul.f32 %v1009_v39, %v1009_v39  ;;  %v438_v43 = vpop.f32.mrb[11].mxu0  ;;  %v478_v44 = vpop.f32.mrb[11].mxu1  ;;  %v542_v33 = vmul.f32 %v1011_v40, %v1011_v40  ;;  %v516_v37 = vsel %vm490_vm1, %v1011_v40, 0.0 }
 0x120   : > { %v501_v45 = vadd.f32 %v500_v41, %v499_v36  ;;  %v568_v36 = vsel %vm490_vm1, %v541_v26, 0.0 }
 0x121   : > { %v554_v46 = vsel %vm490_vm1, %v534_v42, 0.0  ;;  %v570_v44 = vsel %vm490_vm1, %v542_v33, 0.0 }
 0x122   : > { %v555_v47 = vadd.f32 %v554_v46, %v553_v38  ;;  %v1018_v48 = vpop.f32.mrb[12].mxu0  ;;  %v1020_v49 = vpop.f32.mrb[12].mxu1 }
 0x123   : > { %v502_v50 = vsel %vm490_vm1, %v1018_v48, 0.0  ;;  %v535_v51 = vmul.f32 %v1018_v48, %v1018_v48  ;;  %v443_v52 = vpop.f32.mrb[13].mxu0  ;;  %v483_v53 = vpop.f32.mrb[13].mxu1  ;;  %v543_v38 = vmul.f32 %v1020_v49, %v1020_v49 }
 0x124   : > { %v503_v54 = vadd.f32 %v502_v50, %v501_v45  ;;  %v518_v45 = vsel %vm490_vm1, %v1020_v49, 0.0 }
 0x125   : > { %v556_v55 = vsel %vm490_vm1, %v535_v51, 0.0  ;;  %v572_v51 = vsel %vm490_vm1, %v543_v38, 0.0 }
 0x126   : > { %v557_v56 = vadd.f32 %v556_v55, %v555_v47  ;;  %v1027_v57 = vpop.f32.mrb[14].mxu0  ;;  %v1029_v58 = vpop.f32.mrb[14].mxu1 }
 0x127   : > { %v504_v62 = vsel %vm490_vm1, %v1027_v57, 0.0  ;;  %v536_v63 = vmul.f32 %v1027_v57, %v1027_v57  ;;  %v448_v0 = vpop.f32.mrb[15].mxu0  ;;  %v488_v3 = vpop.f32.mrb[15].mxu1  ;;  %v544_v41 = vmul.f32 %v1029_v58, %v1029_v58  ;;  %v520_v46 = vsel %vm490_vm1, %v1029_v58, 0.0 }
 0x128   : > { %v505_v4 = vadd.f32 %v504_v62, %v503_v54 }
 0x129   : > { %v558_v7 = vsel %vm490_vm1, %v536_v63, 0.0  ;;  %v574_v52 = vsel %vm490_vm1, %v544_v41, 0.0 }
 0x12a   : > { %v507_v8 = vadd.f32 %v506_v5, %v505_v4  ;;  %v559_v9 = vadd.f32 %v558_v7, %v557_v56 }
 0x12c   : > { %v509_v15 = vadd.f32 %v508_v11, %v507_v8  ;;  %v561_v16 = vadd.f32 %v560_v10, %v559_v9 }
 0x12e   : > { %v563_v20 = vadd.f32 %v562_v17, %v561_v16  ;;  %v511_v23 = vadd.f32 %v510_v18, %v509_v15  ;;  %v593_v17 = vlaneseq }
 0x130   : > { %v513_v27 = vadd.f32 %v512_v25, %v511_v23  ;;  %v565_v28 = vadd.f32 %v564_v24, %v563_v20  ;;  %v594_v18 = vshrl.u32 %v593_v17, 7  ;;  %v588_v25 = vld [vmem:[%s240_s30] sm:$0x1] }
 0x132   : > { %v515_v34 = vadd.f32 %v514_v32, %v513_v27  ;;  %v567_v35 = vadd.f32 %v566_v29, %v565_v28  ;;  %v595_v20 = vsub.s32 0, %v594_v18 }
 0x134   : > { %v569_v42 = vadd.f32 %v568_v36, %v567_v35  ;;  %v517_v43 = vadd.f32 %v516_v37, %v515_v34 }
 0x136   : > { %v571_v47 = vadd.f32 %v570_v44, %v569_v42  ;;  %v519_v50 = vadd.f32 %v518_v45, %v517_v43 }
 0x138   : > { %v573_v53 = vadd.f32 %v572_v51, %v571_v47  ;;  %v521_v54 = vadd.f32 %v520_v46, %v519_v50 }
 0x13a   : > { %v522_v55 = vrot.slane %v521_v54, 4  ;;  %v575_v56 = vadd.f32 %v574_v52, %v573_v53 }
 0x13c   : > { %v523_v59 = vadd.f32 %v522_v55, %v521_v54  ;;  %v576_v62 = vrot.slane %v575_v56, 4 }
 0x13e   : > { %v524_v63 = vrot.slane %v523_v59, 2  ;;  %v577_v0 = vadd.f32 %v576_v62, %v575_v56 }
 0x140   : > { %v525_v3 = vadd.f32 %v524_v63, %v523_v59  ;;  %v578_v4 = vrot.slane %v577_v0, 2 }
 0x142   : > { %v526_v5 = vrot.slane %v525_v3, 1  ;;  %v579_v6 = vadd.f32 %v578_v4, %v577_v0 }
 0x144   : > { %v527_v7 = vadd.f32 %v526_v5, %v525_v3  ;;  %v580_v8 = vrot.slane %v579_v6, 1 }
 0x146   : > { %v528_v9 = vmul.f32 0.0078125, %v527_v7  ;;  %v581_v10 = vadd.f32 %v580_v8, %v579_v6 }
 0x148   : > { %v582_v11 = vmul.f32 0.0078125, %v581_v10  ;;  %v583_v14 = vmul.f32 %v528_v9, %v528_v9 }
 0x14a   : > { %v584_v15 = vsub.f32 %v582_v11, %v583_v14 }
 0x14c   : > { %v585_v16 = vadd.f32 1e-05, %v584_v15 }
 0x14e   : > { %822 = vrsqrt.f32 %v585_v16 }
 0x158   : > { %v823_v23 = vpop.eup %822 }
 0x159   : > { %v589_v24 = vmul.f32 %v823_v23, %v587_v19 }
 0x15b   : > { %v590_v26 = vmul.f32 %v589_v24, %v528_v9  ;;  %v596_v27 = vrot.slane %v589_v24, %v595_v20 }
 0x15d   : > { %v591_v28 = vsub.f32 %v588_v25, %v590_v26  ;;  %v598_v29 = vmul.f32 %v596_v27, %v964_v60  ;;  %v599_v32 = vmul.f32 %v596_v27, %v970_v1  ;;  %v600_v33 = vmul.f32 %v596_v27, %v982_v12 }
 0x15e   : > { %v601_v34 = vmul.f32 %v596_v27, %v991_v21  ;;  %v602_v35 = vmul.f32 %v596_v27, %v1000_v30  ;;  %v603_v36 = vmul.f32 %v596_v27, %v1009_v39  ;;  %v604_v37 = vmul.f32 %v596_v27, %v1018_v48 }
 0x15f   : > { %v605_v38 = vmul.f32 %v596_v27, %v1027_v57  ;;  %v606_v41 = vmul.f32 %v596_v27, %v966_v61  ;;  %v607_v42 = vmul.f32 %v596_v27, %v972_v2  ;;  %v608_v60 = vmul.f32 %v596_v27, %v984_v13 }
 0x160   : > { %v609_v1 = vmul.f32 %v596_v27, %v993_v22  ;;  %v610_v12 = vmul.f32 %v596_v27, %v1002_v31  ;;  %v611_v21 = vmul.f32 %v596_v27, %v1011_v40  ;;  %v612_v30 = vmul.f32 %v596_v27, %v1020_v49 }
 0x161   : > { %v613_v39 = vmul.f32 %v596_v27, %v1029_v58  ;;  %v618_v48 = vrot.slane %v591_v28, %v595_v20 }
 0x163   : > { %v620_v61 = vadd.f32 %v618_v48, %v598_v29  ;;  %v621_v2 = vadd.f32 %v618_v48, %v599_v32  ;;  %v622_v13 = vadd.f32 %v618_v48, %v600_v33  ;;  %v623_v22 = vadd.f32 %v618_v48, %v601_v34 }
 0x164   : > { %v624_v31 = vadd.f32 %v618_v48, %v602_v35  ;;  %v625_v40 = vadd.f32 %v618_v48, %v603_v36  ;;  %v626_v49 = vadd.f32 %v618_v48, %v604_v37  ;;  %v627_v57 = vadd.f32 %v618_v48, %v605_v38 }
 0x165   : > { %v628_v58 = vadd.f32 %v618_v48, %v606_v41  ;;  %v629_v43 = vadd.f32 %v618_v48, %v607_v42  ;;  %v630_v44 = vadd.f32 %v618_v48, %v608_v60  ;;  %v631_v45 = vadd.f32 %v618_v48, %v609_v1  ;;  %636 = vst.msk [vmem:[%s1104_s8] sm:$0xff] %vm490_vm1, %v620_v61 }
 0x166   : > { %637 = vst.msk [vmem:[%s1104_s8 + $0x8] sm:$0xff] %vm490_vm1, %v621_v2  ;;  %638 = vst.msk [vmem:[%s1104_s8 + $0x10] sm:$0xff] %vm490_vm1, %v622_v13  ;;  %v632_v46 = vadd.f32 %v618_v48, %v610_v12  ;;  %v633_v47 = vadd.f32 %v618_v48, %v611_v21  ;;  %v634_v50 = vadd.f32 %v618_v48, %v612_v30 }
 0x167   : > { %639 = vst.msk [vmem:[%s1104_s8 + $0x18] sm:$0xff] %vm490_vm1, %v623_v22  ;;  %v635_v51 = vadd.f32 %v618_v48, %v613_v39  ;;  %640 = vst.msk [vmem:[%s1104_s8 + $0x20] sm:$0xff] %vm490_vm1, %v624_v31 }
 0x168   : > { %641 = vst.msk [vmem:[%s1104_s8 + $0x28] sm:$0xff] %vm490_vm1, %v625_v40  ;;  %642 = vst.msk [vmem:[%s1104_s8 + $0x30] sm:$0xff] %vm490_vm1, %v626_v49 }
 0x169   : > { %643 = vst.msk [vmem:[%s1104_s8 + $0x38] sm:$0xff] %vm490_vm1, %v627_v57  ;;  %644 = vst.msk [vmem:[%s1104_s8 + $0x40] sm:$0xff] %vm490_vm1, %v628_v58 }
 0x16a   : > { %645 = vst.msk [vmem:[%s1104_s8 + $0x48] sm:$0xff] %vm490_vm1, %v629_v43  ;;  %646 = vst.msk [vmem:[%s1104_s8 + $0x50] sm:$0xff] %vm490_vm1, %v630_v44 }
 0x16b   : > { %647 = vst.msk [vmem:[%s1104_s8 + $0x58] sm:$0xff] %vm490_vm1, %v631_v45  ;;  %648 = vst.msk [vmem:[%s1104_s8 + $0x60] sm:$0xff] %vm490_vm1, %v632_v46 }
 0x16c   : > { %649 = vst.msk [vmem:[%s1104_s8 + $0x68] sm:$0xff] %vm490_vm1, %v633_v47  ;;  %650 = vst.msk [vmem:[%s1104_s8 + $0x70] sm:$0xff] %vm490_vm1, %v634_v50 }
 0x16d   : > { %651 = vst.msk [vmem:[%s1104_s8 + $0x78] sm:$0xff] %vm490_vm1, %v635_v51 }
 0x16e PF: > { %s14_s15 = sadd.s32 1, %s830_s15  }
 0x16f   : > { %p11_p4 = scmp.ge.s32.totalorder %s14_s15, 4  }
 0x171   :  { %13 = sbr.rel (!%p11_p4) target bundleno = 1 (0x1), region = 75 }

</bundles_post_ra>
